<compile_context>
chip_gen: v5e
topology: v5e:2x2
jax: 0.10.0
libtpu: 0.0.40
codegen_flags: <defaults>
</compile_context>

<pallas_src>
import math
import jax
import jax.numpy as jnp
from jax.experimental import pallas as pl
from jax.experimental.pallas import tpu as pltpu


def _round_up(x, m):
    return (x + m - 1) // m * m


def _pick_tile(dim, candidates):
    """Largest candidate that evenly divides `dim` (dim is a 128 multiple)."""
    for c in candidates:
        if dim % c == 0:
            return c
    return dim


# --------------------------------------------------------------------------
# Fused kernel: out[i, j] = A[i, :] @ (X @ W[:, j]) + b[j]
# --------------------------------------------------------------------------
def _fused_gcn_kernel(x_ref, w_ref, a_ref, b_ref, o_ref, support_ref):
    # Recompute this column-block of `support = X @ W` once per j (outer grid
    # axis), i.e. on the first row tile; it then stays resident in VMEM
    # scratch for every A row-tile of the inner i axis.
    @pl.when(pl.program_id(1) == 0)
    def _():
        support_ref[...] = jnp.dot(x_ref[...], w_ref[...],
                                   preferred_element_type=jnp.float32)

    out = jnp.dot(a_ref[...], support_ref[...],
                  preferred_element_type=jnp.float32)
    o_ref[...] = (out + b_ref[...]).astype(o_ref.dtype)


def _fused_vmem_bytes(n_pad, fin_pad, tm, tn):
    """Conservative (everything double-buffered) f32 VMEM footprint estimate."""
    return 4 * (2 * n_pad * fin_pad    # X (resident, counted double-buffered)
                + 2 * fin_pad * tn     # W column block
                + 2 * tm * n_pad       # A row block
                + 2 * tn               # bias tile
                + 2 * tm * tn          # output tile
                + n_pad * tn)          # support scratch (single)


def _fused_gcn(x, w, adj, bias2d, *, tm, tn):
    n_pad, fin_pad = x.shape
    _, fout_pad = w.shape
    n_i = n_pad // tm
    n_j = fout_pad // tn

    vmem_need = _fused_vmem_bytes(n_pad, fin_pad, tm, tn)
    vmem_limit = int(min(vmem_need + (8 << 20), 60 << 20))

    return pl.pallas_call(
        _fused_gcn_kernel,
        out_shape=jax.ShapeDtypeStruct((n_pad, fout_pad), x.dtype),
        grid_spec=pltpu.PrefetchScalarGridSpec(
            num_scalar_prefetch=0,
            grid=(n_j, n_i),
            in_specs=[
                pl.BlockSpec((n_pad, fin_pad), lambda j, i: (0, 0)),  # X (resident)
                pl.BlockSpec((fin_pad, tn), lambda j, i: (0, j)),     # W col block
                pl.BlockSpec((tm, n_pad), lambda j, i: (i, 0)),       # A row block
                pl.BlockSpec((1, tn), lambda j, i: (0, j)),           # bias
            ],
            out_specs=pl.BlockSpec((tm, tn), lambda j, i: (i, j)),
            scratch_shapes=[pltpu.VMEM((n_pad, tn), jnp.float32)]),
        compiler_params=pltpu.CompilerParams(
            dimension_semantics=("parallel", "arbitrary"),
            vmem_limit_bytes=vmem_limit),
    )(x, w, adj, bias2d)


# --------------------------------------------------------------------------
# Fallback (large problems): classic tiled matmul with bias fused on the
# last k step. Big tiles (up to 512) for DMA amortization / MXU fill.
# --------------------------------------------------------------------------
def _matmul_bias_kernel(a_ref, b_ref, bias_ref, o_ref, acc_ref):
    @pl.when(pl.program_id(2) == 0)
    def _():
        acc_ref[...] = jnp.zeros_like(acc_ref)

    acc_ref[...] += jnp.dot(a_ref[...], b_ref[...],
                            preferred_element_type=jnp.float32)

    @pl.when(pl.program_id(2) == pl.num_programs(2) - 1)
    def _():
        o_ref[...] = (acc_ref[...] + bias_ref[...]).astype(o_ref.dtype)


def _tiled_matmul_bias(a, b, bias2d):
    M, K = a.shape
    _, N = b.shape
    tm = _pick_tile(M, (512, 256, 128))
    tn = _pick_tile(N, (256, 128))
    tk = _pick_tile(K, (512, 256, 128))

    vmem_need = 4 * (2 * (tm * tk + tk * tn + tm * tn + tn) + tm * tn)
    vmem_limit = int(min(vmem_need + (8 << 20), 60 << 20))

    return pl.pallas_call(
        _matmul_bias_kernel,
        out_shape=jax.ShapeDtypeStruct((M, N), a.dtype),
        grid_spec=pltpu.PrefetchScalarGridSpec(
            num_scalar_prefetch=0,
            grid=(M // tm, N // tn, K // tk),
            in_specs=[pl.BlockSpec((tm, tk), lambda i, j, k: (i, k)),
                      pl.BlockSpec((tk, tn), lambda i, j, k: (k, j)),
                      pl.BlockSpec((1, tn), lambda i, j, k: (0, j))],
            out_specs=pl.BlockSpec((tm, tn), lambda i, j, k: (i, j)),
            scratch_shapes=[pltpu.VMEM((tm, tn), jnp.float32)]),
        compiler_params=pltpu.CompilerParams(
            dimension_semantics=("parallel", "parallel", "arbitrary"),
            vmem_limit_bytes=vmem_limit),
    )(a, b, bias2d)


# --------------------------------------------------------------------------
# Public forward
# --------------------------------------------------------------------------
def graph_convolution2_forward(x, adj, weight, bias=None):
    """GraphConvolution2.forward: adj @ (x @ weight) + bias (adj dense)."""
    N, F_in = x.shape
    F_in2, F_out = weight.shape
    assert F_in == F_in2
    dtype = x.dtype

    # Pad every dim to a multiple of 128 (lane-aligned tiles, no masked stores).
    n_pad = _round_up(N, 128)
    fin_pad = _round_up(F_in, 128)
    fout_pad = _round_up(F_out, 128)

    x_p = jnp.pad(x, ((0, n_pad - N), (0, fin_pad - F_in)))
    w_p = jnp.pad(weight, ((0, fin_pad - F_in), (0, fout_pad - F_out)))
    a_p = jnp.pad(adj, ((0, n_pad - N), (0, n_pad - N)))
    if bias is None:
        b_p = jnp.zeros((1, fout_pad), dtype=dtype)
    else:
        b_p = jnp.pad(bias.reshape(1, F_out), ((0, 0), (0, fout_pad - F_out)))

    tm = _pick_tile(n_pad, (512, 256, 128))
    tn = _pick_tile(fout_pad, (256, 128))

    # Fused single-kernel path whenever the footprint is comfortably inside
    # v7x's 64 MiB physical VMEM (also fine on v5e/v6e's 128 MiB).
    if _fused_vmem_bytes(n_pad, fin_pad, tm, tn) <= (44 << 20):
        out_p = _fused_gcn(x_p, w_p, a_p, b_p, tm=tm, tn=tn)
    else:
        # TODO(synk): torch.spmm sparse adjacency path not implemented; very
        # large graphs fall back to two dense tiled matmuls through HBM.
        zero_b = jnp.zeros((1, fout_pad), dtype=dtype)
        support = _tiled_matmul_bias(x_p, w_p, zero_b)   # X @ W
        out_p = _tiled_matmul_bias(a_p, support, b_p)    # A @ support + bias

    return out_p[:N, :F_out]


def init_graph_convolution2_params(key, in_features, out_features,
                                   with_bias=True, dtype=jnp.float32):
    """Deterministic re-implementation of reset_parameters()."""
    stdv = 1.0 / math.sqrt(out_features)
    k_w, k_b = jax.random.split(key)
    weight = jax.random.uniform(k_w, (in_features, out_features),
                                minval=-stdv, maxval=stdv, dtype=dtype)
    bias = None
    if with_bias:
        bias = jax.random.uniform(k_b, (out_features,),
                                  minval=-stdv, maxval=stdv, dtype=dtype)
    return weight, bias


if __name__ == "__main__":
    key = jax.random.PRNGKey(0)
    k_x, k_adj, k_params = jax.random.split(key, 3)

    # Non-128-multiple shapes to exercise the padding path.
    N = 200
    in_features = 96
    out_features = 80

    x = jax.random.normal(k_x, (N, in_features), dtype=jnp.float32)

    # Synthetic row-normalized dense adjacency.
    a_raw = jax.random.uniform(k_adj, (N, N), dtype=jnp.float32)
    a_raw = (a_raw > 0.9).astype(jnp.float32) + jnp.eye(N, dtype=jnp.float32)
    deg = jnp.sum(a_raw, axis=1, keepdims=True)
    adj = a_raw / deg

    weight, bias = init_graph_convolution2_params(
        k_params, in_features, out_features, with_bias=True)

    out = graph_convolution2_forward(x, adj, weight, bias)
    out = jax.block_until_ready(out)

    # Reference check against plain JAX.
    ref = adj @ (x @ weight) + bias
    assert out.shape == (N, out_features)
    assert jnp.allclose(out, ref, atol=5e-4, rtol=5e-4), \
        float(jnp.max(jnp.abs(out - ref)))

    # Also exercise the no-bias path.
    out_nb = jax.block_until_ready(
        graph_convolution2_forward(x, adj, weight, None))
    ref_nb = adj @ (x @ weight)
    assert jnp.allclose(out_nb, ref_nb, atol=5e-4, rtol=5e-4)

    print("KERNEL_OK")
</pallas_src>

<mosaic_0001>
module attributes {stable_mosaic.version = 11 : i64} {
  func.func @_fused_gcn_kernel(%arg0: i32, %arg1: i32, %arg2: memref<256x128xf32, #tpu.memory_space<vmem>>, %arg3: memref<128x128xf32, #tpu.memory_space<vmem>>, %arg4: memref<256x256xf32, #tpu.memory_space<vmem>>, %arg5: memref<1x128xf32, #tpu.memory_space<vmem>>, %arg6: memref<256x128xf32, #tpu.memory_space<vmem>>, %arg7: memref<256x128xf32, #tpu.memory_space<vmem>>) attributes {dimension_semantics = [#tpu.dimension_semantics<parallel>, #tpu.dimension_semantics<arbitrary>], iteration_bounds = array<i64: 1, 1>, scalar_prefetch = 0 : i64, scratch_operands = 1 : i64, tpu.core_type = #tpu.core_type<tc>, window_params = [{pipeline_mode = #tpu.pipeline_mode<synchronous>, transform_indices = @transform_0, window_bounds = array<i64: 256, 128>}, {transform_indices = @transform_1, window_bounds = array<i64: 128, 128>}, {transform_indices = @transform_2, window_bounds = array<i64: 256, 256>}, {transform_indices = @transform_3, window_bounds = array<i64: 1, 128>}, {transform_indices = @transform_4, window_bounds = array<i64: 256, 128>}]} {
    %c0_i32 = arith.constant 0 : i32
    %0 = arith.cmpi eq, %arg1, %c0_i32 : i32
    %1 = arith.extui %0 : i1 to i32
    %c0_i32_0 = arith.constant 0 : i32
    %2 = arith.cmpi ne, %1, %c0_i32_0 : i32
    scf.if %2 {
      %c0_8 = arith.constant 0 : index
      %c0_9 = arith.constant 0 : index
      %10 = vector.load %arg2[%c0_8, %c0_9] : memref<256x128xf32, #tpu.memory_space<vmem>>, vector<256x128xf32>
      %c0_10 = arith.constant 0 : index
      %c0_11 = arith.constant 0 : index
      %11 = vector.load %arg3[%c0_10, %c0_11] : memref<128x128xf32, #tpu.memory_space<vmem>>, vector<128x128xf32>
      %cst_12 = arith.constant dense<0.000000e+00> : vector<256x128xf32>
      %12 = tpu.matmul %10, %11, %cst_12 {dimension_numbers = #tpu.dot_dimension_numbers<[1], [0], [0], [1], [0, 0, 1, 1], [], []>} : vector<256x128xf32>, vector<128x128xf32>, vector<256x128xf32> -> vector<256x128xf32>
      %c0_13 = arith.constant 0 : index
      %c0_14 = arith.constant 0 : index
      %13 = vector.load %arg7[%c0_13, %c0_14] : memref<256x128xf32, #tpu.memory_space<vmem>>, vector<256x128xf32>
      tpu.vector_store %arg7[%c0_13, %c0_14], %12 {strides = array<i32>} : memref<256x128xf32, #tpu.memory_space<vmem>>, vector<256x128xf32>,
    } else {
    }
    %c0 = arith.constant 0 : index
    %c0_1 = arith.constant 0 : index
    %3 = vector.load %arg4[%c0, %c0_1] : memref<256x256xf32, #tpu.memory_space<vmem>>, vector<256x256xf32>
    %c0_2 = arith.constant 0 : index
    %c0_3 = arith.constant 0 : index
    %4 = vector.load %arg7[%c0_2, %c0_3] : memref<256x128xf32, #tpu.memory_space<vmem>>, vector<256x128xf32>
    %cst = arith.constant dense<0.000000e+00> : vector<256x128xf32>
    %5 = tpu.matmul %3, %4, %cst {dimension_numbers = #tpu.dot_dimension_numbers<[1], [0], [0], [1], [0, 0, 1, 1], [], []>} : vector<256x256xf32>, vector<256x128xf32>, vector<256x128xf32> -> vector<256x128xf32>
    %c0_4 = arith.constant 0 : index
    %c0_5 = arith.constant 0 : index
    %6 = vector.load %arg5[%c0_4, %c0_5] : memref<1x128xf32, #tpu.memory_space<vmem>>, vector<1x128xf32>
    %7 = vector.broadcast %6 : vector<1x128xf32> to vector<256x128xf32>
    %8 = arith.addf %5, %7 : vector<256x128xf32>
    %c0_6 = arith.constant 0 : index
    %c0_7 = arith.constant 0 : index
    %9 = vector.load %arg6[%c0_6, %c0_7] : memref<256x128xf32, #tpu.memory_space<vmem>>, vector<256x128xf32>
    tpu.vector_store %arg6[%c0_6, %c0_7], %8 {strides = array<i32>} : memref<256x128xf32, #tpu.memory_space<vmem>>, vector<256x128xf32>,
    return
  }
  func.func @transform_0(%arg0: i32, %arg1: i32) -> (i32, i32) {
    %c0_i32 = arith.constant 0 : i32
    %c0_i32_0 = arith.constant 0 : i32
    %c0_i32_1 = arith.constant 0 : i32
    return %c0_i32, %c0_i32_0 : i32, i32
  }
  func.func @transform_1(%arg0: i32, %arg1: i32) -> (i32, i32) {
    %c0_i32 = arith.constant 0 : i32
    %c0_i32_0 = arith.constant 0 : i32
    return %c0_i32, %arg0 : i32, i32
  }
  func.func @transform_2(%arg0: i32, %arg1: i32) -> (i32, i32) {
    %c0_i32 = arith.constant 0 : i32
    %c0_i32_0 = arith.constant 0 : i32
    return %arg1, %c0_i32 : i32, i32
  }
  func.func @transform_3(%arg0: i32, %arg1: i32) -> (i32, i32) {
    %c0_i32 = arith.constant 0 : i32
    %c0_i32_0 = arith.constant 0 : i32
    return %c0_i32, %arg0 : i32, i32
  }
  func.func @transform_4(%arg0: i32, %arg1: i32) -> (i32, i32) {
    %c0_i32 = arith.constant 0 : i32
    return %arg1, %arg0 : i32, i32
  }
}

</mosaic_0001>

<bundles_post_ra>
// kernel: tpu_custom_call.1
= control target key start
LH: loop header
LB: loop body
LE: loop exit
PB: predicated region body
PF: predicated region fallthrough
CT: control target
= control target key end

     0   :  { %9 = vsyncpa [#allocation4], 0  ;;  %s954_s0 = inlined_call_operand.hbm [shape: f32[256,128], index: 0, kind: input, shape index: {}]   ;;  %s955_s1 = inlined_call_operand.hbm [shape: f32[128,128], index: 1, kind: input, shape index: {}]   ;;  %s956_s2 = inlined_call_operand.hbm [shape: f32[256,256], index: 2, kind: input, shape index: {}]   ;;  %s957_s3 = inlined_call_operand.vmem [shape: f32[1,128], index: 3, kind: input, shape index: {}]   ;;  %s958_s4 = inlined_call_operand.hbm [shape: f32[256,128], index: 4, kind: output, shape index: {}]  }
   0x1   :  { %10 = vsyncpa [#allocation7], 0 }
   0x2   :  { %11 = vsyncpa [#allocation5], 0  ;;  %s29_s17 = sshll.u32 %s955_s1, 4  ;;  %s799_s18 = smov [#allocation6]   ;;  %s30_s17 = int_to_ptr.hbm [resolvable:$true] %s29_s17 }
   0x3   :  { %s31_s19 = sshll.u32 %s799_s18, 4  ;;  %s16_s22 = sshll.u32 %s954_s0, 4  ;;  %s32_s19 = int_to_ptr.vmem [resolvable:$true] %s31_s19  ;;  %s17_s22 = int_to_ptr.hbm [resolvable:$true] %s16_s22 }
   0x4   :  { %s800_s23 = smov 128   ;;  %s801_s24 = smov 8  }
   0x5   :  { %37 = dma.hbm_to_vmem [thread:$0]  %s30_s17, 2048, %s32_s19, [#allocation7], %s800_s23, %s800_s23, %s801_s24  }
   0x6   :  { %s802_s25 = smov [#allocation3]   ;;  %s42_s1 = sshll.u32 %s956_s2, 4  ;;  %s43_s1 = int_to_ptr.hbm [resolvable:$true] %s42_s1 }
   0x7   :  { %s18_s26 = sshll.u32 %s802_s25, 4  ;;  %s803_s0 = smov [#allocation8]   ;;  %s19_s26 = int_to_ptr.vmem [resolvable:$true] %s18_s26 }
   0x8   :  { %24 = dma.hbm_to_vmem [thread:$0]  %s17_s22, 4096, %s19_s26, [#allocation4], %s800_s23, %s800_s23, %s801_s24  }
   0x9   :  { %s44_s29 = sshll.u32 %s803_s0, 4  ;;  %s804_s30 = smov 256   ;;  %s45_s29 = int_to_ptr.vmem [resolvable:$true] %s44_s29 }
   0xa   :  { %s805_s5 = smov 16  }
   0xb   :  { %50 = dma.hbm_to_vmem [thread:$0]  %s43_s1, 8192, %s45_s29, [#allocation7], %s804_s30, %s804_s30, %s805_s5  }
   0xc   :  { %793 = dma.done.wait [#allocation4], 4096  }
   0xd   :  { %794 = vsyncadd [#allocation4], 4294963200 }
   0xe   :  { %795 = dma.done.wait [#allocation7], 10240  }
   0xf   :  { %796 = vsyncadd [#allocation7], 4294957056  ;;  %v116_v0 = vld [vmem:[#allocation6 + $0x78] sm:$0xff]  ;;  %v115_v1 = vld [vmem:[#allocation6 + $0x70] sm:$0xff]  ;;  %s626_s10 = sshll.u32 %s958_s4, 4  ;;  %s627_s10 = int_to_ptr.hbm [resolvable:$true] %s626_s10 }
  0x10   :  { %117 = vmatpush.msra.mxu0 %v116_v0  ;;  %640 = vmatpush.msra.mxu3 %v116_v0  ;;  %v114_v2 = vld [vmem:[#allocation6 + $0x68] sm:$0xff]  ;;  %v113_v3 = vld [vmem:[#allocation6 + $0x60] sm:$0xff]  ;;  %v112_v4 = vld [vmem:[#allocation6 + $0x58] sm:$0xff] }
  0x11   :  { %v111_v5 = vld [vmem:[#allocation6 + $0x50] sm:$0xff]  ;;  %v110_v6 = vld [vmem:[#allocation6 + $0x48] sm:$0xff]  ;;  %v109_v7 = vld [vmem:[#allocation6 + $0x40] sm:$0xff] }
  0x12   :  { %118 = vmatpush.msra.mxu0 %v115_v1  ;;  %641 = vmatpush.msra.mxu3 %v115_v1  ;;  %v108_v8 = vld [vmem:[#allocation6 + $0x38] sm:$0xff]  ;;  %v107_v9 = vld [vmem:[#allocation6 + $0x30] sm:$0xff]  ;;  %v106_v10 = vld [vmem:[#allocation6 + $0x28] sm:$0xff] }
  0x13   :  { %v105_v11 = vld [vmem:[#allocation6 + $0x20] sm:$0xff]  ;;  %v104_v12 = vld [vmem:[#allocation6 + $0x18] sm:$0xff]  ;;  %v103_v13 = vld [vmem:[#allocation6 + $0x10] sm:$0xff] }
  0x14   :  { %119 = vmatpush.msra.mxu0 %v114_v2  ;;  %642 = vmatpush.msra.mxu3 %v114_v2  ;;  %v102_v14 = vld [vmem:[#allocation6 + $0x8] sm:$0xff]  ;;  %v101_v15 = vld [vmem:[#allocation6] sm:$0xff]  ;;  %v71_v20 = vld [vmem:[#allocation3 + $0x10] sm:$0xff] }
  0x15   :  { %v69_v16 = vld [vmem:[#allocation3] sm:$0xff]  ;;  %v70_v18 = vld [vmem:[#allocation3 + $0x8] sm:$0xff]  ;;  %v95_v21 = vld [vmem:[#allocation3 + $0xd0] sm:$0xff] }
  0x16   :  { %120 = vmatpush.msra.mxu0 %v113_v3  ;;  %643 = vmatpush.msra.mxu3 %v113_v3  ;;  %v93_v17 = vld [vmem:[#allocation3 + $0xc0] sm:$0xff]  ;;  %v94_v19 = vld [vmem:[#allocation3 + $0xc8] sm:$0xff]  ;;  %v72_v22 = vld [vmem:[#allocation3 + $0x18] sm:$0xff] }
  0x17   :  { %v96_v23 = vld [vmem:[#allocation3 + $0xd8] sm:$0xff]  ;;  %v73_v24 = vld [vmem:[#allocation3 + $0x20] sm:$0xff]  ;;  %v74_v26 = vld [vmem:[#allocation3 + $0x28] sm:$0xff] }
  0x18   :  { %121 = vmatpush.msra.mxu0 %v112_v4  ;;  %644 = vmatpush.msra.mxu3 %v112_v4  ;;  %v97_v25 = vld [vmem:[#allocation3 + $0xe0] sm:$0xff]  ;;  %v98_v27 = vld [vmem:[#allocation3 + $0xe8] sm:$0xff]  ;;  %v75_v28 = vld [vmem:[#allocation3 + $0x30] sm:$0xff] }
  0x19   :  { %v99_v29 = vld [vmem:[#allocation3 + $0xf0] sm:$0xff]  ;;  %v76_v30 = vld [vmem:[#allocation3 + $0x38] sm:$0xff]  ;;  %v77_v32 = vld [vmem:[#allocation3 + $0x40] sm:$0xff] }
  0x1a   :  { %122 = vmatpush.msra.mxu0 %v111_v5  ;;  %645 = vmatpush.msra.mxu3 %v111_v5  ;;  %v100_v31 = vld [vmem:[#allocation3 + $0xf8] sm:$0xff]  ;;  %v78_v33 = vld [vmem:[#allocation3 + $0x48] sm:$0xff]  ;;  %v79_v34 = vld [vmem:[#allocation3 + $0x50] sm:$0xff] }
  0x1b   :  { %v80_v35 = vld [vmem:[#allocation3 + $0x58] sm:$0xff]  ;;  %v81_v36 = vld [vmem:[#allocation3 + $0x60] sm:$0xff]  ;;  %v82_v37 = vld [vmem:[#allocation3 + $0x68] sm:$0xff] }
  0x1c   :  { %123 = vmatpush.msra.mxu0 %v110_v6  ;;  %646 = vmatpush.msra.mxu3 %v110_v6  ;;  %v83_v38 = vld [vmem:[#allocation3 + $0x70] sm:$0xff]  ;;  %v84_v39 = vld [vmem:[#allocation3 + $0x78] sm:$0xff]  ;;  %v85_v41 = vld [vmem:[#allocation3 + $0x80] sm:$0xff] }
  0x1d   :  { %v86_v43 = vld [vmem:[#allocation3 + $0x88] sm:$0xff]  ;;  %v87_v46 = vld [vmem:[#allocation3 + $0x90] sm:$0xff]  ;;  %v88_v49 = vld [vmem:[#allocation3 + $0x98] sm:$0xff] }
  0x1e   :  { %124 = vmatpush.msra.mxu0 %v109_v7  ;;  %647 = vmatpush.msra.mxu3 %v109_v7  ;;  %v89_v52 = vld [vmem:[#allocation3 + $0xa0] sm:$0xff]  ;;  %v90_v55 = vld [vmem:[#allocation3 + $0xa8] sm:$0xff]  ;;  %v91_v58 = vld [vmem:[#allocation3 + $0xb0] sm:$0xff] }
  0x1f   :  { %v92_v61 = vld [vmem:[#allocation3 + $0xb8] sm:$0xff] }
  0x20   :  { %125 = vmatpush.msra.mxu0 %v108_v8  ;;  %648 = vmatpush.msra.mxu3 %v108_v8 }
  0x22   :  { %126 = vmatpush.msra.mxu0 %v107_v9  ;;  %649 = vmatpush.msra.mxu3 %v107_v9 }
  0x24   :  { %127 = vmatpush.msra.mxu0 %v106_v10  ;;  %650 = vmatpush.msra.mxu3 %v106_v10 }
  0x26   :  { %128 = vmatpush.msra.mxu0 %v105_v11  ;;  %651 = vmatpush.msra.mxu3 %v105_v11 }
  0x28   :  { %129 = vmatpush.msra.mxu0 %v104_v12  ;;  %652 = vmatpush.msra.mxu3 %v104_v12 }
  0x2a   :  { %130 = vmatpush.msra.mxu0 %v103_v13  ;;  %653 = vmatpush.msra.mxu3 %v103_v13 }
  0x2c   :  { %131 = vmatpush.msra.mxu0 %v102_v14  ;;  %654 = vmatpush.msra.mxu3 %v102_v14  ;;  %v310_v14 = vld [vmem:[#allocation8 + $0x180] sm:$0xff] }
  0x2e   :  { %132 = vmatpush.msra.mxu0 %v101_v15  ;;  %655 = vmatpush.msra.mxu3 %v101_v15  ;;  %v262_v15 = vld [vmem:[#allocation8] sm:$0xff] }
  0x2f   :  { %133 = vmatmul.f32.vlgmr.msra.gmra.mxu0 %v69_v16  ;;  %205 = vmatmul.f32.vlgmr.msra.gmra.mxu3 %v93_v17  ;;  %v312_v17 = vld [vmem:[#allocation8 + $0x190] sm:$0xff] }
  0x37   :  { %136 = vmatmul.f32.gmra.mxu0 %v70_v18  ;;  %208 = vmatmul.f32.gmra.mxu3 %v94_v19  ;;  %v264_v18 = vld [vmem:[#allocation8 + $0x10] sm:$0xff] }
  0x3f   :  { %139 = vmatmul.f32.gmra.mxu0 %v71_v20  ;;  %211 = vmatmul.f32.gmra.mxu3 %v95_v21  ;;  %v314_v20 = vld [vmem:[#allocation8 + $0x1a0] sm:$0xff] }
  0x40   :  { %v266_v21 = vld [vmem:[#allocation8 + $0x20] sm:$0xff] }
  0x47   :  { %142 = vmatmul.f32.gmra.mxu0 %v72_v22  ;;  %214 = vmatmul.f32.gmra.mxu3 %v96_v23  ;;  %v316_v22 = vld [vmem:[#allocation8 + $0x1b0] sm:$0xff] }
  0x48   :  { %v268_v23 = vld [vmem:[#allocation8 + $0x30] sm:$0xff] }
  0x4f   :  { %145 = vmatmul.f32.gmra.mxu0 %v73_v24  ;;  %217 = vmatmul.f32.gmra.mxu3 %v97_v25  ;;  %v263_v24 = vld [vmem:[#allocation8 + $0x8] sm:$0xff]  ;;  %v318_v25 = vld [vmem:[#allocation8 + $0x1c0] sm:$0xff] }
  0x57   :  { %148 = vmatmul.f32.gmra.mxu0 %v74_v26  ;;  %220 = vmatmul.f32.gmra.mxu3 %v98_v27  ;;  %v270_v26 = vld [vmem:[#allocation8 + $0x40] sm:$0xff]  ;;  %v265_v27 = vld [vmem:[#allocation8 + $0x18] sm:$0xff] }
  0x5f   :  { %151 = vmatmul.f32.gmra.mxu0 %v75_v28  ;;  %223 = vmatmul.f32.gmra.mxu3 %v99_v29  ;;  %v320_v28 = vld [vmem:[#allocation8 + $0x1d0] sm:$0xff] }
  0x60   :  { %v272_v29 = vld [vmem:[#allocation8 + $0x50] sm:$0xff] }
  0x67   :  { %154 = vmatmul.f32.gmra.mxu0 %v76_v30  ;;  %226 = vmatmul.f32.gmra.mxu3 %v100_v31  ;;  %v267_v30 = vld [vmem:[#allocation8 + $0x28] sm:$0xff]  ;;  %v322_v31 = vld [vmem:[#allocation8 + $0x1e0] sm:$0xff] }
  0x6f   :  { %157 = vmatmul.f32.gmra.mxu0 %v77_v32  ;;  %v274_v32 = vld [vmem:[#allocation8 + $0x60] sm:$0xff] }
  0x77   :  { %160 = vmatmul.f32.gmra.mxu0 %v78_v33  ;;  %v269_v33 = vld [vmem:[#allocation8 + $0x38] sm:$0xff] }
  0x7f   :  { %163 = vmatmul.f32.gmra.mxu0 %v79_v34  ;;  %v324_v34 = vld [vmem:[#allocation8 + $0x1f0] sm:$0xff] }
  0x87   :  { %166 = vmatmul.f32.gmra.mxu0 %v80_v35  ;;  %v276_v35 = vld [vmem:[#allocation8 + $0x70] sm:$0xff] }
  0x8f   :  { %169 = vmatmul.f32.gmra.mxu0 %v81_v36  ;;  %v271_v36 = vld [vmem:[#allocation8 + $0x48] sm:$0xff] }
  0x97   :  { %172 = vmatmul.f32.gmra.mxu0 %v82_v37  ;;  %v311_v37 = vld [vmem:[#allocation8 + $0x188] sm:$0xff] }
  0x9f   :  { %175 = vmatmul.f32.gmra.mxu0 %v83_v38  ;;  %v278_v38 = vld [vmem:[#allocation8 + $0x80] sm:$0xff] }
  0xa7   :  { %178 = vmatmul.f32.gmra.mxu0 %v84_v39  ;;  %v273_v39 = vld [vmem:[#allocation8 + $0x58] sm:$0xff] }
  0xac   :  { %v847_v40 = vpop.f32.mrf.mxu0 }
  0xaf   :  { %181 = vmatmul.f32.gmra.mxu0 %v85_v41  ;;  %v280_v41 = vld [vmem:[#allocation8 + $0x90] sm:$0xff] }
  0xb2   :  { %v851_v44 = vpop.f32.mrf.mxu3 }
  0xb4   :  { %v849_v42 = vpop.f32.mrf.mxu0 }
  0xb7   :  { %184 = vmatmul.f32.gmra.mxu0 %v86_v43  ;;  %v315_v43 = vld [vmem:[#allocation8 + $0x1a8] sm:$0xff] }
  0xba   :  { %v855_v47 = vpop.f32.mrf.mxu3 }
  0xbc   :  { %v853_v45 = vpop.f32.mrf.mxu0 }
  0xbf   :  { %187 = vmatmul.f32.gmra.mxu0 %v87_v46  ;;  %v317_v46 = vld [vmem:[#allocation8 + $0x1b8] sm:$0xff] }
  0xc2   :  { %v859_v50 = vpop.f32.mrf.mxu3 }
  0xc4   :  { %v857_v48 = vpop.f32.mrf.mxu0 }
  0xc7   :  { %190 = vmatmul.f32.gmra.mxu0 %v88_v49  ;;  %v319_v49 = vld [vmem:[#allocation8 + $0x1c8] sm:$0xff] }
  0xca   :  { %v861_v53 = vpop.f32.mrf.mxu3 }
  0xcc   :  { %v146_v51 = vpop.f32.mrf.mxu0 }
  0xcf   :  { %193 = vmatmul.f32.gmra.mxu0 %v89_v52  ;;  %v321_v52 = vld [vmem:[#allocation8 + $0x1d8] sm:$0xff] }
  0xd2   :  { %v863_v56 = vpop.f32.mrf.mxu3 }
  0xd4   :  { %v149_v54 = vpop.f32.mrf.mxu0 }
  0xd7   :  { %196 = vmatmul.f32.gmra.mxu0 %v90_v55  ;;  %v323_v55 = vld [vmem:[#allocation8 + $0x1e8] sm:$0xff] }
  0xda   :  { %v221_v59 = vpop.f32.mrf.mxu3 }
  0xdc   :  { %v152_v57 = vpop.f32.mrf.mxu0 }
  0xdf   :  { %199 = vmatmul.f32.gmra.mxu0 %v91_v58  ;;  %v325_v58 = vld [vmem:[#allocation8 + $0x1f8] sm:$0xff] }
  0xe2   :  { %v224_v62 = vpop.f32.mrf.mxu3 }
  0xe4   :  { %v155_v60 = vpop.f32.mrf.mxu0 }
  0xe7   :  { %202 = vmatmul.f32.gmra.mxu0 %v92_v61 }
  0xea   :  { %v227_v0 = vpop.f32.mrf.mxu3 }
  0xeb   :  { %475 = vmatpush.msra.mxu2 %v227_v0 }
  0xec   :  { %v158_v63 = vpop.f32.mrf.mxu0 }
  0xed   :  { %476 = vmatpush.msra.mxu2 %v224_v62 }
  0xef   :  { %477 = vmatpush.msra.mxu2 %v221_v59 }
  0xf1   :  { %478 = vmatpush.msra.mxu2 %v863_v56 }
  0xf3   :  { %479 = vmatpush.msra.mxu2 %v861_v53 }
  0xf4   :  { %v161_v1 = vpop.f32.mrf.mxu0 }
  0xf5   :  { %480 = vmatpush.msra.mxu2 %v859_v50 }
  0xf7   :  { %481 = vmatpush.msra.mxu2 %v855_v47 }
  0xf9   :  { %482 = vmatpush.msra.mxu2 %v851_v44 }
  0xfc   :  { %v164_v2 = vpop.f32.mrf.mxu0 }
 0x104   :  { %v167_v3 = vpop.f32.mrf.mxu0 }
 0x10c   :  { %v170_v4 = vpop.f32.mrf.mxu0 }
 0x114   :  { %v173_v5 = vpop.f32.mrf.mxu0 }
 0x11c   :  { %v176_v6 = vpop.f32.mrf.mxu0 }
 0x124   :  { %v179_v7 = vpop.f32.mrf.mxu0 }
 0x125   :  { %362 = vmatpush.msra.mxu1 %v179_v7  ;;  %656 = vmatpush.msrb.mxu3 %v179_v7  ;;  %v293_v7 = vld [vmem:[#allocation8 + $0xf8] sm:$0xff] }
 0x127   :  { %363 = vmatpush.msra.mxu1 %v176_v6  ;;  %657 = vmatpush.msrb.mxu3 %v176_v6  ;;  %v298_v6 = vld [vmem:[#allocation8 + $0x120] sm:$0xff] }
 0x129   :  { %364 = vmatpush.msra.mxu1 %v173_v5  ;;  %658 = vmatpush.msrb.mxu3 %v173_v5 }
 0x12b   :  { %365 = vmatpush.msra.mxu1 %v170_v4  ;;  %659 = vmatpush.msrb.mxu3 %v170_v4 }
 0x12c   :  { %v870_v8 = vpop.f32.mrf.mxu0 }
 0x12d   :  { %366 = vmatpush.msra.mxu1 %v167_v3  ;;  %660 = vmatpush.msrb.mxu3 %v167_v3  ;;  %v291_v3 = vld [vmem:[#allocation8 + $0xe8] sm:$0xff] }
 0x12f   :  { %367 = vmatpush.msra.mxu1 %v164_v2  ;;  %661 = vmatpush.msrb.mxu3 %v164_v2  ;;  %v296_v2 = vld [vmem:[#allocation8 + $0x110] sm:$0xff] }
 0x131   :  { %368 = vmatpush.msra.mxu1 %v161_v1  ;;  %662 = vmatpush.msrb.mxu3 %v161_v1 }
 0x133   :  { %369 = vmatpush.msra.mxu1 %v158_v63  ;;  %663 = vmatpush.msrb.mxu3 %v158_v63  ;;  %v289_v63 = vld [vmem:[#allocation8 + $0xd8] sm:$0xff] }
 0x134   :  { %v185_v9 = vpop.f32.mrf.mxu0 }
 0x135   :  { %370 = vmatpush.msra.mxu1 %v155_v60  ;;  %664 = vmatpush.msrb.mxu3 %v155_v60  ;;  %v287_v60 = vld [vmem:[#allocation8 + $0xc8] sm:$0xff] }
 0x137   :  { %371 = vmatpush.msra.mxu1 %v152_v57  ;;  %665 = vmatpush.msrb.mxu3 %v152_v57  ;;  %v285_v57 = vld [vmem:[#allocation8 + $0xb8] sm:$0xff] }
 0x139   :  { %372 = vmatpush.msra.mxu1 %v149_v54  ;;  %666 = vmatpush.msrb.mxu3 %v149_v54  ;;  %v283_v54 = vld [vmem:[#allocation8 + $0xa8] sm:$0xff] }
 0x13b   :  { %373 = vmatpush.msra.mxu1 %v146_v51  ;;  %667 = vmatpush.msrb.mxu3 %v146_v51  ;;  %v281_v51 = vld [vmem:[#allocation8 + $0x98] sm:$0xff] }
 0x13c   :  { %v188_v10 = vpop.f32.mrf.mxu0 }
 0x13d   :  { %374 = vmatpush.msra.mxu1 %v857_v48  ;;  %668 = vmatpush.msrb.mxu3 %v857_v48  ;;  %v279_v48 = vld [vmem:[#allocation8 + $0x88] sm:$0xff] }
 0x13f   :  { %375 = vmatpush.msra.mxu1 %v853_v45  ;;  %669 = vmatpush.msrb.mxu3 %v853_v45  ;;  %v277_v45 = vld [vmem:[#allocation8 + $0x78] sm:$0xff] }
 0x141   :  { %376 = vmatpush.msra.mxu1 %v849_v42  ;;  %670 = vmatpush.msrb.mxu3 %v849_v42  ;;  %v275_v42 = vld [vmem:[#allocation8 + $0x68] sm:$0xff] }
 0x143   :  { %377 = vmatpush.msra.mxu1 %v847_v40  ;;  %671 = vmatpush.msrb.mxu3 %v847_v40  ;;  %v313_v40 = vld [vmem:[#allocation8 + $0x198] sm:$0xff] }
 0x144   :  { %v191_v11 = vpop.f32.mrf.mxu0  ;;  %450 = vmatmul.f32.vlgmr.msrb.gmra.mxu3 %v310_v14  ;;  %378 = vmatmul.f32.vlgmr.msra.gmra.mxu1 %v262_v15 }
 0x145   :  { %672 = vmatpush.msra.mxu3 %v227_v0 }
 0x147   :  { %673 = vmatpush.msra.mxu3 %v224_v62  ;;  %v294_v62 = vld [vmem:[#allocation8 + $0x100] sm:$0xff] }
 0x149   :  { %674 = vmatpush.msra.mxu3 %v221_v59  ;;  %v292_v59 = vld [vmem:[#allocation8 + $0xf0] sm:$0xff] }
 0x14b   :  { %675 = vmatpush.msra.mxu3 %v863_v56  ;;  %v290_v56 = vld [vmem:[#allocation8 + $0xe0] sm:$0xff] }
 0x14c   :  { %v194_v12 = vpop.f32.mrf.mxu0  ;;  %453 = vmatmul.f32.gmra.mxu3 %v312_v17  ;;  %381 = vmatmul.f32.gmra.mxu1 %v264_v18  ;;  %v302_v17 = vld [vmem:[#allocation8 + $0x140] sm:$0xff] }
 0x14d   :  { %676 = vmatpush.msra.mxu3 %v861_v53  ;;  %v288_v53 = vld [vmem:[#allocation8 + $0xd0] sm:$0xff] }
 0x14f   :  { %677 = vmatpush.msra.mxu3 %v859_v50  ;;  %v286_v50 = vld [vmem:[#allocation8 + $0xc0] sm:$0xff] }
 0x151   :  { %678 = vmatpush.msra.mxu3 %v855_v47  ;;  %v284_v47 = vld [vmem:[#allocation8 + $0xb0] sm:$0xff] }
 0x153   :  { %679 = vmatpush.msra.mxu3 %v851_v44  ;;  %v282_v44 = vld [vmem:[#allocation8 + $0xa0] sm:$0xff] }
 0x154   :  { %v197_v13 = vpop.f32.mrf.mxu0  ;;  %456 = vmatmul.f32.gmra.mxu3 %v314_v20  ;;  %384 = vmatmul.f32.gmra.mxu1 %v266_v21 }
 0x15c   :  { %v200_v16 = vpop.f32.mrf.mxu0  ;;  %459 = vmatmul.f32.gmra.mxu3 %v316_v22  ;;  %387 = vmatmul.f32.gmra.mxu1 %v268_v23 }
 0x164   :  { %v203_v19 = vpop.f32.mrf.mxu0  ;;  %462 = vmatmul.f32.gmra.mxu3 %v318_v25  ;;  %390 = vmatmul.f32.gmra.mxu1 %v270_v26  ;;  %v299_v26 = vld [vmem:[#allocation8 + $0x128] sm:$0xff] }
 0x165   :  { %483 = vmatpush.msra.mxu2 %v203_v19  ;;  %680 = vmatpush.msra.mxu3 %v203_v19  ;;  %v297_v19 = vld [vmem:[#allocation8 + $0x118] sm:$0xff] }
 0x167   :  { %484 = vmatpush.msra.mxu2 %v200_v16  ;;  %681 = vmatpush.msra.mxu3 %v200_v16 }
 0x169   :  { %485 = vmatpush.msra.mxu2 %v197_v13  ;;  %682 = vmatpush.msra.mxu3 %v197_v13 }
 0x16b   :  { %486 = vmatpush.msra.mxu2 %v194_v12  ;;  %683 = vmatpush.msra.mxu3 %v194_v12  ;;  %v295_v12 = vld [vmem:[#allocation8 + $0x108] sm:$0xff] }
 0x16c   :  { %465 = vmatmul.f32.gmra.mxu3 %v320_v28  ;;  %393 = vmatmul.f32.gmra.mxu1 %v272_v29 }
 0x16d   :  { %487 = vmatpush.msra.mxu2 %v191_v11  ;;  %684 = vmatpush.msra.mxu3 %v191_v11  ;;  %v896_v11 = vld [vmem:[%s957_s3] ss:$0 sm:$0xff]  ;;  %s806_s3 = smov [#allocation9]  }
 0x16e   :  { %s624_s7 = sshll.u32 %s806_s3, 4  ;;  %s625_s7 = int_to_ptr.vmem [resolvable:$true] %s624_s7 }
 0x16f   :  { %488 = vmatpush.msra.mxu2 %v188_v10  ;;  %685 = vmatpush.msra.mxu3 %v188_v10  ;;  %v300_v10 = vld [vmem:[#allocation8 + $0x130] sm:$0xff] }
 0x171   :  { %489 = vmatpush.msra.mxu2 %v185_v9  ;;  %686 = vmatpush.msra.mxu3 %v185_v9 }
 0x173   :  { %490 = vmatpush.msra.mxu2 %v870_v8  ;;  %687 = vmatpush.msra.mxu3 %v870_v8 }
 0x174   :  { %491 = vmatmul.f32.vlgmr.msra.gmra.mxu2 %v263_v24  ;;  %468 = vmatmul.f32.gmra.mxu3 %v322_v31  ;;  %v304_v24 = vld [vmem:[#allocation8 + $0x150] sm:$0xff]  ;;  %v306_v31 = vld [vmem:[#allocation8 + $0x160] sm:$0xff] }
 0x175   :  { %396 = vmatmul.f32.gmra.mxu1 %v274_v32 }
 0x17c   :  { %494 = vmatmul.f32.gmra.mxu2 %v265_v27  ;;  %471 = vmatmul.f32.gmra.mxu3 %v324_v34 }
 0x17d   :  { %399 = vmatmul.f32.gmra.mxu1 %v276_v35 }
 0x184   :  { %497 = vmatmul.f32.gmra.mxu2 %v267_v30  ;;  %563 = vmatmul.f32.vlgmr.msra.gmra.mxu3 %v311_v37 }
 0x185   :  { %402 = vmatmul.f32.gmra.mxu1 %v278_v38  ;;  %v308_v38 = vld [vmem:[#allocation8 + $0x170] sm:$0xff] }
 0x18c   :  { %500 = vmatmul.f32.gmra.mxu2 %v269_v33  ;;  %566 = vmatmul.f32.gmra.mxu3 %v313_v40  ;;  %v301_v33 = vld [vmem:[#allocation8 + $0x138] sm:$0xff]  ;;  %v303_v40 = vld [vmem:[#allocation8 + $0x148] sm:$0xff] }
 0x18d   :  { %405 = vmatmul.f32.gmra.mxu1 %v280_v41 }
 0x194   :  { %503 = vmatmul.f32.gmra.mxu2 %v271_v36  ;;  %569 = vmatmul.f32.gmra.mxu3 %v315_v43 }
 0x195   :  { %408 = vmatmul.f32.gmra.mxu1 %v282_v44 }
 0x19c   :  { %506 = vmatmul.f32.gmra.mxu2 %v273_v39  ;;  %572 = vmatmul.f32.gmra.mxu3 %v317_v46 }
 0x19d   :  { %411 = vmatmul.f32.gmra.mxu1 %v284_v47  ;;  %v305_v47 = vld [vmem:[#allocation8 + $0x158] sm:$0xff] }
 0x1a4   :  { %509 = vmatmul.f32.gmra.mxu2 %v275_v42  ;;  %575 = vmatmul.f32.gmra.mxu3 %v319_v49 }
 0x1a5   :  { %414 = vmatmul.f32.gmra.mxu1 %v286_v50 }
 0x1ac   :  { %512 = vmatmul.f32.gmra.mxu2 %v277_v45  ;;  %578 = vmatmul.f32.gmra.mxu3 %v321_v52 }
 0x1ad   :  { %417 = vmatmul.f32.gmra.mxu1 %v288_v53 }
 0x1b4   :  { %515 = vmatmul.f32.gmra.mxu2 %v279_v48  ;;  %581 = vmatmul.f32.gmra.mxu3 %v323_v55  ;;  %v307_v55 = vld [vmem:[#allocation8 + $0x168] sm:$0xff] }
 0x1b5   :  { %420 = vmatmul.f32.gmra.mxu1 %v290_v56 }
 0x1bc   :  { %518 = vmatmul.f32.gmra.mxu2 %v281_v51  ;;  %584 = vmatmul.f32.gmra.mxu3 %v325_v58 }
 0x1bd   :  { %423 = vmatmul.f32.gmra.mxu1 %v292_v59 }
 0x1c1   :  { %v379_v61 = vpop.f32.mrf.mxu1 }
 0x1c2   :  { %v380_v14 = vadd.f32 %v896_v11, %v379_v61 }
 0x1c4   :  { %521 = vmatmul.f32.gmra.mxu2 %v283_v54 }
 0x1c5   :  { %426 = vmatmul.f32.gmra.mxu1 %v294_v62 }
 0x1c7   :  { %v887_v0 = vpop.f32.mrf.mxu3 }
 0x1c8   :  { %v452_v44 = vadd.f32 %v896_v11, %v887_v0 }
 0x1c9   :  { %v382_v1 = vpop.f32.mrf.mxu1 }
 0x1ca   :  { %v383_v21 = vadd.f32 %v896_v11, %v382_v1 }
 0x1cc   :  { %524 = vmatmul.f32.gmra.mxu2 %v285_v57 }
 0x1cd   :  { %429 = vmatmul.f32.gmra.mxu1 %v296_v2 }
 0x1cf   :  { %v889_v4 = vpop.f32.mrf.mxu3 }
 0x1d0   :  { %v455_v52 = vadd.f32 %v896_v11, %v889_v4 }
 0x1d1   :  { %v385_v5 = vpop.f32.mrf.mxu1 }
 0x1d2   :  { %v386_v28 = vadd.f32 %v896_v11, %v385_v5 }
 0x1d4   :  { %527 = vmatmul.f32.gmra.mxu2 %v287_v60 }
 0x1d5   :  { %432 = vmatmul.f32.gmra.mxu1 %v298_v6 }
 0x1d7   :  { %v891_v8 = vpop.f32.mrf.mxu3 }
 0x1d8   :  { %v458_v59 = vadd.f32 %v896_v11, %v891_v8 }
 0x1d9   :  { %v388_v9 = vpop.f32.mrf.mxu1 }
 0x1da   :  { %v389_v35 = vadd.f32 %v896_v11, %v388_v9 }
 0x1dc   :  { %530 = vmatmul.f32.gmra.mxu2 %v289_v63  ;;  %v309_v63 = vld [vmem:[#allocation8 + $0x178] sm:$0xff] }
 0x1dd   :  { %435 = vmatmul.f32.gmra.mxu1 %v300_v10 }
 0x1df   :  { %v898_v13 = vpop.f32.mrf.mxu3 }
 0x1e1   :  { %v391_v15 = vpop.f32.mrf.mxu1 }
 0x1e2   :  { %v392_v42 = vadd.f32 %v896_v11, %v391_v15 }
 0x1e4   :  { %533 = vmatmul.f32.gmra.mxu2 %v291_v3  ;;  %v461_v3 = vadd.f32 %v896_v11, %v898_v13 }
 0x1e5   :  { %438 = vmatmul.f32.gmra.mxu1 %v302_v17 }
 0x1e7   :  { %v901_v20 = vpop.f32.mrf.mxu3 }
 0x1e8   :  { %v464_v10 = vadd.f32 %v896_v11, %v901_v20 }
 0x1e9   :  { %v394_v22 = vpop.f32.mrf.mxu1 }
 0x1ea   :  { %v395_v50 = vadd.f32 %v896_v11, %v394_v22 }
 0x1ec   :  { %536 = vmatmul.f32.gmra.mxu2 %v293_v7 }
 0x1ed   :  { %441 = vmatmul.f32.gmra.mxu1 %v304_v24 }
 0x1ef   :  { %v904_v27 = vpop.f32.mrf.mxu3 }
 0x1f2   :  { %v397_v29 = vpop.f32.mrf.mxu1 }
 0x1f3   :  { %v398_v58 = vadd.f32 %v896_v11, %v397_v29 }
 0x1f4   :  { %539 = vmatmul.f32.gmra.mxu2 %v295_v12 }
 0x1f5   :  { %444 = vmatmul.f32.gmra.mxu1 %v306_v31 }
 0x1f7   :  { %v492_v16 = vpop.f32.mrf.mxu2  ;;  %v907_v34 = vpop.f32.mrf.mxu3 }
 0x1f8   :  { %v493_v18 = vadd.f32 %v492_v16, %v380_v14 }
 0x1fa   :  { %588 = vst [vmem:[#allocation9] sm:$0xff] %v493_v18  ;;  %v400_v36 = vpop.f32.mrf.mxu1  ;;  %v467_v18 = vadd.f32 %v896_v11, %v904_v27 }
 0x1fb   :  { %v401_v2 = vadd.f32 %v896_v11, %v400_v36 }
 0x1fc   :  { %542 = vmatmul.f32.gmra.mxu2 %v297_v19 }
 0x1fd   :  { %447 = vmatmul.f32.gmra.mxu1 %v308_v38 }
 0x1ff   :  { %v495_v23 = vpop.f32.mrf.mxu2  ;;  %v910_v41 = vpop.f32.mrf.mxu3 }
 0x200   :  { %v496_v25 = vadd.f32 %v495_v23, %v383_v21  ;;  %v473_v27 = vadd.f32 %v896_v11, %v910_v41 }
 0x202   :  { %589 = vst [vmem:[#allocation9 + $0x8] sm:$0xff] %v496_v25  ;;  %v403_v43 = vpop.f32.mrf.mxu1  ;;  %v470_v25 = vadd.f32 %v896_v11, %v907_v34 }
 0x203   :  { %v404_v9 = vadd.f32 %v896_v11, %v403_v43 }
 0x204   :  { %545 = vmatmul.f32.gmra.mxu2 %v299_v26 }
 0x207   :  { %v498_v30 = vpop.f32.mrf.mxu2  ;;  %v564_v48 = vpop.f32.mrf.mxu3 }
 0x208   :  { %v499_v32 = vadd.f32 %v498_v30, %v386_v28  ;;  %v565_v49 = vadd.f32 %v564_v48, %v452_v44 }
 0x20a   :  { %590 = vst [vmem:[#allocation9 + $0x10] sm:$0xff] %v499_v32  ;;  %v406_v51 = vpop.f32.mrf.mxu1 }
 0x20b   :  { %612 = vst [vmem:[#allocation9 + $0xc0] sm:$0xff] %v565_v49  ;;  %v407_v13 = vadd.f32 %v896_v11, %v406_v51 }
 0x20c   :  { %548 = vmatmul.f32.gmra.mxu2 %v301_v33 }
 0x20f   :  { %v501_v37 = vpop.f32.mrf.mxu2  ;;  %v567_v56 = vpop.f32.mrf.mxu3 }
 0x210   :  { %v502_v39 = vadd.f32 %v501_v37, %v389_v35  ;;  %v568_v57 = vadd.f32 %v567_v56, %v455_v52 }
 0x212   :  { %591 = vst [vmem:[#allocation9 + $0x18] sm:$0xff] %v502_v39  ;;  %v409_v61 = vpop.f32.mrf.mxu1 }
 0x213   :  { %613 = vst [vmem:[#allocation9 + $0xc8] sm:$0xff] %v568_v57  ;;  %v410_v24 = vadd.f32 %v896_v11, %v409_v61 }
 0x214   :  { %551 = vmatmul.f32.gmra.mxu2 %v303_v40 }
 0x217   :  { %v504_v45 = vpop.f32.mrf.mxu2  ;;  %v570_v0 = vpop.f32.mrf.mxu3 }
 0x218   :  { %v505_v46 = vadd.f32 %v504_v45, %v392_v42  ;;  %v571_v1 = vadd.f32 %v570_v0, %v458_v59 }
 0x21a   :  { %592 = vst [vmem:[#allocation9 + $0x20] sm:$0xff] %v505_v46  ;;  %v412_v6 = vpop.f32.mrf.mxu1 }
 0x21b   :  { %614 = vst [vmem:[#allocation9 + $0xd0] sm:$0xff] %v571_v1  ;;  %v413_v31 = vadd.f32 %v896_v11, %v412_v6 }
 0x21c   :  { %554 = vmatmul.f32.gmra.mxu2 %v305_v47 }
 0x21f   :  { %v507_v53 = vpop.f32.mrf.mxu2  ;;  %v573_v7 = vpop.f32.mrf.mxu3 }
 0x220   :  { %v508_v54 = vadd.f32 %v507_v53, %v395_v50  ;;  %v574_v8 = vadd.f32 %v573_v7, %v461_v3 }
 0x222   :  { %593 = vst [vmem:[#allocation9 + $0x28] sm:$0xff] %v508_v54  ;;  %v415_v17 = vpop.f32.mrf.mxu1 }
 0x223   :  { %615 = vst [vmem:[#allocation9 + $0xd8] sm:$0xff] %v574_v8  ;;  %v416_v38 = vadd.f32 %v896_v11, %v415_v17 }
 0x224   :  { %557 = vmatmul.f32.gmra.mxu2 %v307_v55 }
 0x227   :  { %v510_v60 = vpop.f32.mrf.mxu2  ;;  %v576_v15 = vpop.f32.mrf.mxu3 }
 0x228   :  { %v511_v62 = vadd.f32 %v510_v60, %v398_v58  ;;  %v577_v16 = vadd.f32 %v576_v15, %v464_v10 }
 0x22a   :  { %594 = vst [vmem:[#allocation9 + $0x30] sm:$0xff] %v511_v62  ;;  %v418_v20 = vpop.f32.mrf.mxu1 }
 0x22b   :  { %616 = vst [vmem:[#allocation9 + $0xe0] sm:$0xff] %v577_v16  ;;  %v419_v42 = vadd.f32 %v896_v11, %v418_v20 }
 0x22c   :  { %560 = vmatmul.f32.gmra.mxu2 %v309_v63 }
 0x22f   :  { %v513_v4 = vpop.f32.mrf.mxu2  ;;  %v579_v22 = vpop.f32.mrf.mxu3 }
 0x230   :  { %v514_v5 = vadd.f32 %v513_v4, %v401_v2  ;;  %v580_v23 = vadd.f32 %v579_v22, %v467_v18 }
 0x232   :  { %595 = vst [vmem:[#allocation9 + $0x38] sm:$0xff] %v514_v5  ;;  %v421_v33 = vpop.f32.mrf.mxu1 }
 0x233   :  { %617 = vst [vmem:[#allocation9 + $0xe8] sm:$0xff] %v580_v23  ;;  %v422_v41 = vadd.f32 %v896_v11, %v421_v33 }
 0x237   :  { %v516_v12 = vpop.f32.mrf.mxu2  ;;  %v582_v29 = vpop.f32.mrf.mxu3 }
 0x238   :  { %v517_v14 = vadd.f32 %v516_v12, %v404_v9  ;;  %v583_v30 = vadd.f32 %v582_v29, %v470_v25 }
 0x23a   :  { %596 = vst [vmem:[#allocation9 + $0x40] sm:$0xff] %v517_v14  ;;  %v424_v40 = vpop.f32.mrf.mxu1 }
 0x23b   :  { %618 = vst [vmem:[#allocation9 + $0xf0] sm:$0xff] %v583_v30  ;;  %v425_v48 = vadd.f32 %v896_v11, %v424_v40 }
 0x23f   :  { %v519_v19 = vpop.f32.mrf.mxu2  ;;  %v585_v36 = vpop.f32.mrf.mxu3 }
 0x240   :  { %v520_v21 = vadd.f32 %v519_v19, %v407_v13  ;;  %v586_v37 = vadd.f32 %v585_v36, %v473_v27 }
 0x242   :  { %597 = vst [vmem:[#allocation9 + $0x48] sm:$0xff] %v520_v21  ;;  %v427_v45 = vpop.f32.mrf.mxu1 }
 0x243   :  { %619 = vst [vmem:[#allocation9 + $0xf8] sm:$0xff] %v586_v37  ;;  %v428_v52 = vadd.f32 %v896_v11, %v427_v45 }
 0x247   :  { %v522_v26 = vpop.f32.mrf.mxu2 }
 0x248   :  { %v523_v28 = vadd.f32 %v522_v26, %v410_v24 }
 0x24a   :  { %598 = vst [vmem:[#allocation9 + $0x50] sm:$0xff] %v523_v28  ;;  %v430_v49 = vpop.f32.mrf.mxu1 }
 0x24b   :  { %v431_v56 = vadd.f32 %v896_v11, %v430_v49 }
 0x24f   :  { %v525_v32 = vpop.f32.mrf.mxu2 }
 0x250   :  { %v526_v35 = vadd.f32 %v525_v32, %v413_v31 }
 0x252   :  { %599 = vst [vmem:[#allocation9 + $0x58] sm:$0xff] %v526_v35  ;;  %v433_v54 = vpop.f32.mrf.mxu1 }
 0x253   :  { %v434_v60 = vadd.f32 %v896_v11, %v433_v54 }
 0x257   :  { %v528_v34 = vpop.f32.mrf.mxu2 }
 0x258   :  { %v529_v39 = vadd.f32 %v528_v34, %v416_v38 }
 0x25a   :  { %600 = vst [vmem:[#allocation9 + $0x60] sm:$0xff] %v529_v39  ;;  %v436_v59 = vpop.f32.mrf.mxu1 }
 0x25b   :  { %v437_v0 = vadd.f32 %v896_v11, %v436_v59 }
 0x25f   :  { %v531_v43 = vpop.f32.mrf.mxu2 }
 0x260   :  { %v532_v44 = vadd.f32 %v531_v43, %v419_v42 }
 0x262   :  { %601 = vst [vmem:[#allocation9 + $0x68] sm:$0xff] %v532_v44  ;;  %v439_v63 = vpop.f32.mrf.mxu1 }
 0x263   :  { %v440_v3 = vadd.f32 %v896_v11, %v439_v63 }
 0x267   :  { %v534_v46 = vpop.f32.mrf.mxu2 }
 0x268   :  { %v535_v47 = vadd.f32 %v534_v46, %v422_v41 }
 0x26a   :  { %602 = vst [vmem:[#allocation9 + $0x70] sm:$0xff] %v535_v47  ;;  %v442_v4 = vpop.f32.mrf.mxu1 }
 0x26b   :  { %v443_v7 = vadd.f32 %v896_v11, %v442_v4 }
 0x26f   :  { %v537_v50 = vpop.f32.mrf.mxu2 }
 0x270   :  { %v538_v51 = vadd.f32 %v537_v50, %v425_v48 }
 0x272   :  { %603 = vst [vmem:[#allocation9 + $0x78] sm:$0xff] %v538_v51  ;;  %v445_v9 = vpop.f32.mrf.mxu1 }
 0x273   :  { %v446_v12 = vadd.f32 %v896_v11, %v445_v9 }
 0x277   :  { %v540_v53 = vpop.f32.mrf.mxu2 }
 0x278   :  { %v541_v55 = vadd.f32 %v540_v53, %v428_v52 }
 0x27a   :  { %604 = vst [vmem:[#allocation9 + $0x80] sm:$0xff] %v541_v55  ;;  %v448_v16 = vpop.f32.mrf.mxu1 }
 0x27b   :  { %v449_v17 = vadd.f32 %v896_v11, %v448_v16 }
 0x27f   :  { %v543_v57 = vpop.f32.mrf.mxu2 }
 0x280   :  { %v544_v58 = vadd.f32 %v543_v57, %v431_v56 }
 0x282   :  { %605 = vst [vmem:[#allocation9 + $0x88] sm:$0xff] %v544_v58 }
 0x287   :  { %v546_v61 = vpop.f32.mrf.mxu2 }
 0x288   :  { %v547_v62 = vadd.f32 %v546_v61, %v434_v60 }
 0x28a   :  { %606 = vst [vmem:[#allocation9 + $0x90] sm:$0xff] %v547_v62 }
 0x28f   :  { %v549_v1 = vpop.f32.mrf.mxu2 }
 0x290   :  { %v550_v2 = vadd.f32 %v549_v1, %v437_v0 }
 0x292   :  { %607 = vst [vmem:[#allocation9 + $0x98] sm:$0xff] %v550_v2 }
 0x297   :  { %v552_v5 = vpop.f32.mrf.mxu2 }
 0x298   :  { %v553_v6 = vadd.f32 %v552_v5, %v440_v3 }
 0x29a   :  { %608 = vst [vmem:[#allocation9 + $0xa0] sm:$0xff] %v553_v6 }
 0x29f   :  { %v555_v8 = vpop.f32.mrf.mxu2 }
 0x2a0   :  { %v556_v10 = vadd.f32 %v555_v8, %v443_v7 }
 0x2a2   :  { %609 = vst [vmem:[#allocation9 + $0xa8] sm:$0xff] %v556_v10 }
 0x2a7   :  { %v558_v14 = vpop.f32.mrf.mxu2 }
 0x2a8   :  { %v559_v15 = vadd.f32 %v558_v14, %v446_v12 }
 0x2aa   :  { %610 = vst [vmem:[#allocation9 + $0xb0] sm:$0xff] %v559_v15 }
 0x2af   :  { %v561_v13 = vpop.f32.mrf.mxu2 }
 0x2b0   :  { %v562_v18 = vadd.f32 %v561_v13, %v449_v17 }
 0x2b2   :  { %611 = vst [vmem:[#allocation9 + $0xb8] sm:$0xff] %v562_v18 }
 0x2b3   :  { %632 = dma.vmem_to_hbm [thread:$0]  %s625_s7, 4096, %s627_s10, [#allocation5], %s800_s23, %s800_s23, %s801_s24  }
 0x2b4   :  { %797 = dma.done.wait [#allocation5], 4096  }
 0x2b5   :  { %798 = vsyncadd [#allocation5], 4294963200 }
 0x2b6   :  { %637 = vsyncpa [#allocation4], 1 }
 0x2b7   :  { %638 = vsyncpa [#allocation7], 1 }
 0x2b8   :  { %639 = vsyncpa [#allocation5], 1 }

</bundles_post_ra>
